<compile_context>
chip_gen: v5e
topology: v5e:2x2
jax: 0.10.0
libtpu: 0.0.40
codegen_flags: <defaults>
</compile_context>

<pallas_src>
import numpy as np

import jax
import jax.numpy as jnp
from jax import lax
from jax.experimental import pallas as pl
from jax.experimental.pallas import tpu as pltpu

PAD_IDX, SOS_IDX, EOS_IDX = 0, 1, 2
NEG = -10000.0
LANE = 128  # batch tile width (lane axis)


def _round_up(x, m):
    return ((x + m - 1) // m) * m


def _crf_kernel(trans_bc_ref, h_ref, y0_ref, mask_ref,
                out_ref, bptr_ref, tag_ref,
                z_ref, sc_ref, gs_ref):
    """grid = (batch_blocks [parallel], L [arbitrary]).

    trans_bc_ref : [C_prev, C_next, LANE]  trans_bc[p, c, :] == trans[c, p]
    h_ref        : [1, C, LANE]            per-step emission block
    y0_ref       : [L+1, LANE]             gold tags (resident, tiny)
    mask_ref     : [L, LANE]               validity mask (resident, tiny)
    out_ref      : [3, LANE]               rows: Z, S, best_score (written at last t)
    bptr_ref     : [1, C, LANE]            per-step Viterbi back-pointers
    tag_ref      : [1, LANE]               best final tag (written at last t)
    z/sc/gs_ref  : [C, LANE] f32 scratch   partition / Viterbi / gold-score state
    """
    t = pl.program_id(1)
    n_t = pl.num_programs(1)
    C, TB = z_ref.shape

    tag_iota = lax.broadcasted_iota(jnp.int32, (C, TB), 0)

    @pl.when(t == 0)
    def _init():
        init = jnp.where(tag_iota == SOS_IDX, 0.0, NEG).astype(jnp.float32)
        z_ref[...] = init
        sc_ref[...] = init
        gs_ref[...] = jnp.zeros_like(gs_ref)

    trans_bc = trans_bc_ref[...]                  # [C_p, C_n, TB]
    h_t = h_ref[0]                                # [C, TB]  streamed block
    hs_t = 1.0 / (1.0 + jnp.exp(-h_t))            # exact sigmoid (EUP exp)
    m_t = mask_ref[pl.ds(t, 1), :]                # [1, TB]
    mvalid = m_t > 0.0

    z = z_ref[...]
    sc = sc_ref[...]

    # ---- partition step: LSE over previous tag (leading-axis reduce) -------
    zz = z[:, None, :] + trans_bc                 # [C_p, C_n, TB]
    mz = jnp.max(zz, axis=0)                      # [C_n, TB]
    lse = mz + jnp.log(jnp.sum(jnp.exp(zz - mz[None, :, :]), axis=0))
    z_new = jnp.where(mvalid, lse + hs_t, z)
    z_ref[...] = z_new

    # ---- Viterbi step: max + first-max back-pointer (leading-axis reduce) --
    ss = sc[:, None, :] + trans_bc                # [C_p, C_n, TB]
    ms = jnp.max(ss, axis=0)                      # [C_n, TB]
    pidx = lax.broadcasted_iota(jnp.int32, (C, C, TB), 0)
    bp = jnp.min(jnp.where(ss >= ms[None, :, :], pidx, C), axis=0)
    bptr_ref[...] = bp[None, :, :]                # per-step lane-dense store
    sc_new = jnp.where(mvalid, ms + hs_t, sc)
    sc_ref[...] = sc_new

    # ---- gold score step: trans[y_next, y_prev] * mask[t] ------------------
    y_prev = y0_ref[pl.ds(t, 1), :]               # [1, TB]
    y_next = y0_ref[pl.ds(t + 1, 1), :]           # [1, TB]
    sel_prev = y_prev == tag_iota                 # [C_p, TB]
    sel_next = y_next == tag_iota                 # [C_n, TB]
    u = jnp.sum(jnp.where(sel_prev[:, None, :], trans_bc, 0.0), axis=0)  # trans[c_n, y_prev]
    step_on = jnp.logical_and(mvalid, t < n_t - 1)
    gs_new = gs_ref[...] + jnp.where(jnp.logical_and(sel_next, step_on), u, 0.0)
    gs_ref[...] = gs_new

    @pl.when(t == n_t - 1)
    def _finalize():
        v_eos = trans_bc[:, EOS_IDX, :]           # [C, TB]  trans[EOS, j]
        v_pad = trans_bc[:, PAD_IDX, :]           # [C, TB]  trans[PAD, j]

        # partition finalize: Z = LSE_j(z[j] + trans[EOS, j])
        zf = z_new + v_eos
        mzf = jnp.max(zf, axis=0, keepdims=True)
        z_out = mzf + jnp.log(jnp.sum(jnp.exp(zf - mzf), axis=0, keepdims=True))

        # Viterbi finalize
        scf = sc_new + v_eos
        best = jnp.max(scf, axis=0, keepdims=True)
        btag = jnp.min(jnp.where(scf >= best, tag_iota, C), axis=0, keepdims=True)

        # gold score finalize: + trans[PAD, y0[len]]
        lens = jnp.sum(mask_ref[...], axis=0, keepdims=True).astype(jnp.int32)
        y0_full = y0_ref[...]
        t_iota = lax.broadcasted_iota(jnp.int32, y0_full.shape, 0)
        last_tag = jnp.sum(jnp.where(t_iota == lens, y0_full, 0), axis=0, keepdims=True)
        s_last = jnp.sum(jnp.where(tag_iota == last_tag, v_pad, 0.0),
                         axis=0, keepdims=True)
        s_out = jnp.sum(gs_new, axis=0, keepdims=True) + s_last

        out_ref[...] = jnp.concatenate([z_out, s_out, best], axis=0)   # single store
        tag_ref[...] = btag


@jax.jit
def crf_forward_device(trans, h, y0, mask):
    L, B, C = h.shape
    C_pad = _round_up(max(C, 8), 8)
    B_pad = _round_up(B, LANE)

    # Lane-dense relayout (batch -> lanes) + padding.  Pure layout plumbing.
    h_p = jnp.pad(jnp.transpose(h, (0, 2, 1)).astype(jnp.float32),
                  ((0, 0), (0, C_pad - C), (0, B_pad - B)))
    y0_p = jnp.pad(y0.astype(jnp.int32), ((0, 0), (0, B_pad - B)))
    mask_p = jnp.pad(mask.astype(jnp.float32), ((0, 0), (0, B_pad - B)))

    trans_p = jnp.full((C_pad, C_pad), NEG, jnp.float32).at[:C, :C].set(trans)
    # trans_bc[p, c, :] == trans[c, p]; one-time 32 KiB lane broadcast so the
    # kernel never re-broadcasts the transition table per step.
    trans_bc = jnp.broadcast_to(trans_p.T[:, :, None], (C_pad, C_pad, LANE))

    grid = (B_pad // LANE, L)

    # vmem budget from actual (double-buffered) block sizes, clamped well under
    # v7x's 64 MiB physical VMEM.
    blk_bytes = 4 * LANE * (2 * C_pad            # h blocks (double-buffered)
                            + 2 * C_pad          # bptr out blocks
                            + C_pad * C_pad      # trans_bc (resident)
                            + (L + 1) + L        # y0 + mask (resident)
                            + 3 + 1              # scalar outputs + best tag
                            + 3 * C_pad)         # z / sc / gs scratch
    vmem_limit = int(min(max(4 * blk_bytes, 4 << 20), 64 << 20))

    out_s, bptr, tag = pl.pallas_call(
        _crf_kernel,
        out_shape=(
            jax.ShapeDtypeStruct((3, B_pad), jnp.float32),       # Z, S, best_score
            jax.ShapeDtypeStruct((L, C_pad, B_pad), jnp.int32),  # back-pointers
            jax.ShapeDtypeStruct((1, B_pad), jnp.int32),         # best final tag
        ),
        grid=grid,
        in_specs=[
            pl.BlockSpec((C_pad, C_pad, LANE), lambda b, t: (0, 0, 0)),
            pl.BlockSpec((1, C_pad, LANE), lambda b, t: (t, 0, b)),
            pl.BlockSpec((L + 1, LANE), lambda b, t: (0, b)),
            pl.BlockSpec((L, LANE), lambda b, t: (0, b)),
        ],
        out_specs=(
            pl.BlockSpec((3, LANE), lambda b, t: (0, b)),
            pl.BlockSpec((1, C_pad, LANE), lambda b, t: (t, 0, b)),
            pl.BlockSpec((1, LANE), lambda b, t: (0, b)),
        ),
        scratch_shapes=[
            pltpu.VMEM((C_pad, LANE), jnp.float32),   # z  (partition state)
            pltpu.VMEM((C_pad, LANE), jnp.float32),   # sc (Viterbi state)
            pltpu.VMEM((C_pad, LANE), jnp.float32),   # gs (gold-score accum)
        ],
        compiler_params=pltpu.CompilerParams(
            dimension_semantics=("parallel", "arbitrary"),
            vmem_limit_bytes=vmem_limit,
        ),
    )(trans_bc, h_p, y0_p, mask_p)

    Z = out_s[0, :B]
    S = out_s[1, :B]
    best_score = out_s[2, :B]
    best_tag = tag[0, :B]
    bptr = bptr[:, :, :B]
    loss = jnp.mean(Z - S)
    return loss, Z, S, bptr, best_tag, best_score


def _viterbi_backtrack(bptr, best_tag, mask):
    # TODO(synk): variable-length list outputs have no Pallas equivalent;
    # back-tracking is host-side glue over the kernel's back-pointer tensor.
    bptr = np.asarray(bptr)                      # [L, C, B]
    best_tag = np.asarray(best_tag)              # [B]
    lens = np.asarray(mask).sum(axis=0).astype(int)
    B = bptr.shape[2]
    paths = []
    for b in range(B):
        i = int(best_tag[b])
        path = [i]
        for t in reversed(range(int(lens[b]))):
            i = int(bptr[t, i, b])
            path.append(i)
        path.pop()
        path.reverse()
        paths.append(path)
    return paths


def crf_forward(trans, h, y0, mask):
    """Mirrors CRF.forward(h, y0, mask) -> (loss, best_paths)."""
    loss, Z, S, bptr, best_tag, best_score = crf_forward_device(trans, h, y0, mask)
    jax.block_until_ready((loss, Z, S, bptr, best_tag, best_score))
    paths = _viterbi_backtrack(bptr, best_tag, mask)
    return loss, paths


def _crf_reference_numpy(trans, h, y0, mask):
    """Pure numpy transcription of the PyTorch CRF (score/partition/decode)."""
    trans = np.asarray(trans, np.float64)
    h = np.asarray(h, np.float64)
    y0 = np.asarray(y0)
    mask = np.asarray(mask, np.float64)
    L, B, C = h.shape

    S = np.zeros((B,), np.float64)
    for t in range(L - 1):
        S += trans[y0[t + 1], y0[t]] * mask[t]
    lens = mask.sum(0).astype(int)
    last_tag = y0[lens, np.arange(B)]
    S += trans[PAD_IDX, last_tag]

    hs = 1.0 / (1.0 + np.exp(-h))
    Z = np.full((B, C), NEG, np.float64)
    Z[:, SOS_IDX] = 0.0
    for t in range(L):
        zz = Z[:, None, :] + hs[t][:, :, None] + trans[None, :, :]
        m = zz.max(axis=2, keepdims=True)
        lse = m[..., 0] + np.log(np.exp(zz - m).sum(axis=2))
        Z = np.where(mask[t][:, None] > 0, lse, Z)
    zf = Z + trans[EOS_IDX][None, :]
    m = zf.max(axis=1, keepdims=True)
    Z_out = m[:, 0] + np.log(np.exp(zf - m).sum(axis=1))

    score = np.full((B, C), NEG, np.float64)
    score[:, SOS_IDX] = 0.0
    bptr = np.zeros((L, B, C), np.int64)
    for t in range(L):
        ss = score[:, None, :] + trans[None, :, :]
        bptr[t] = ss.argmax(axis=2)
        new = ss.max(axis=2) + hs[t]
        score = np.where(mask[t][:, None] > 0, new, score)
    score = score + trans[EOS_IDX][None, :]
    best_tag = score.argmax(axis=1)
    best_score = score.max(axis=1)
    paths = []
    for b in range(B):
        i = int(best_tag[b])
        path = [i]
        for t in reversed(range(int(lens[b]))):
            i = int(bptr[t, b, i])
            path.append(i)
        path.pop()
        path.reverse()
        paths.append(path)
    return Z_out, S, best_score, paths


if __name__ == "__main__":
    key = jax.random.PRNGKey(0)
    k1, k2, k3 = jax.random.split(key, 3)

    num_tags = 8          # C
    L, B = 8, 4           # sequence length, batch

    # Deterministic parameter init, matching CRF.__init__.
    trans = jax.random.normal(k1, (num_tags, num_tags), jnp.float32) * 0.01
    trans = trans.at[SOS_IDX, :].set(NEG)
    trans = trans.at[:, EOS_IDX].set(NEG)
    trans = trans.at[:, PAD_IDX].set(NEG)
    trans = trans.at[PAD_IDX, :].set(NEG)
    trans = trans.at[PAD_IDX, EOS_IDX].set(0.0)
    trans = trans.at[PAD_IDX, PAD_IDX].set(0.0)

    h = jax.random.normal(k2, (L, B, num_tags), jnp.float32)
    lens = jnp.array([8, 6, 5, 3], jnp.int32)
    mask = (jnp.arange(L)[:, None] < lens[None, :]).astype(jnp.float32)   # [L, B]
    tags = jax.random.randint(k3, (L, B), 3, num_tags).astype(jnp.int32)
    y0 = jnp.concatenate(
        [jnp.full((1, B), SOS_IDX, jnp.int32), tags], axis=0)            # [L+1, B]

    loss, paths = crf_forward(trans, h, y0, mask)
    _, Z, S, _, _, best_score = crf_forward_device(trans, h, y0, mask)
    jax.block_until_ready((loss, Z, S, best_score))

    # Validate against a pure-numpy transcription of the PyTorch module.
    Z_ref, S_ref, bs_ref, paths_ref = _crf_reference_numpy(trans, h, y0, mask)
    np.testing.assert_allclose(np.asarray(Z), Z_ref, rtol=2e-4, atol=2e-2)
    np.testing.assert_allclose(np.asarray(S), S_ref, rtol=2e-4, atol=2e-2)
    np.testing.assert_allclose(np.asarray(best_score), bs_ref, rtol=2e-4, atol=2e-2)

    assert np.isfinite(float(loss))
    assert len(paths) == B
    for b in range(B):
        assert len(paths[b]) == int(lens[b])
        assert paths[b] == paths_ref[b]

    print("KERNEL_OK")
</pallas_src>

<mosaic_0001>
module attributes {stable_mosaic.version = 11 : i64} {
  func.func @_crf_kernel(%arg0: i32, %arg1: i32, %arg2: memref<8x8x128xf32, #tpu.memory_space<vmem>>, %arg3: memref<1x8x128xf32, #tpu.memory_space<vmem>>, %arg4: memref<9x128xi32, #tpu.memory_space<vmem>>, %arg5: memref<8x128xf32, #tpu.memory_space<vmem>>, %arg6: memref<3x128xf32, #tpu.memory_space<vmem>>, %arg7: memref<1x8x128xi32, #tpu.memory_space<vmem>>, %arg8: memref<1x128xi32, #tpu.memory_space<vmem>>, %arg9: memref<8x128xf32, #tpu.memory_space<vmem>>, %arg10: memref<8x128xf32, #tpu.memory_space<vmem>>, %arg11: memref<8x128xf32, #tpu.memory_space<vmem>>) attributes {dimension_semantics = [#tpu.dimension_semantics<parallel>, #tpu.dimension_semantics<arbitrary>], iteration_bounds = array<i64: 1, 8>, scalar_prefetch = 0 : i64, scratch_operands = 3 : i64, tpu.core_type = #tpu.core_type<tc>, window_params = [{pipeline_mode = #tpu.pipeline_mode<synchronous>, transform_indices = @transform_0, window_bounds = array<i64: 8, 8, 128>}, {transform_indices = @transform_1, window_bounds = array<i64: 1, 8, 128>}, {transform_indices = @transform_2, window_bounds = array<i64: 9, 128>}, {transform_indices = @transform_3, window_bounds = array<i64: 8, 128>}, {transform_indices = @transform_4, window_bounds = array<i64: 3, 128>}, {transform_indices = @transform_5, window_bounds = array<i64: 1, 8, 128>}, {transform_indices = @transform_6, window_bounds = array<i64: 1, 128>}]} {
    %0 = tpu.iota {dimensions = array<i32: 0>} : vector<8x128xi32>
    %c0_i32 = arith.constant 0 : i32
    %1 = arith.cmpi eq, %arg1, %c0_i32 : i32
    %2 = arith.extui %1 : i1 to i32
    %c0_i32_0 = arith.constant 0 : i32
    %3 = arith.cmpi ne, %2, %c0_i32_0 : i32
    scf.if %3 {
      %c1_i32_36 = arith.constant 1 : i32
      %82 = vector.broadcast %c1_i32_36 : i32 to vector<8x128xi32>
      %83 = arith.cmpi eq, %0, %82 : vector<8x128xi32>
      %cst_37 = arith.constant 0.000000e+00 : f32
      %cst_38 = arith.constant -1.000000e+04 : f32
      %84 = vector.broadcast %cst_37 : f32 to vector<8x128xf32>
      %85 = vector.broadcast %cst_38 : f32 to vector<8x128xf32>
      %86 = arith.select %83, %84, %85 : vector<8x128xi1>, vector<8x128xf32>
      %c0_39 = arith.constant 0 : index
      %c0_40 = arith.constant 0 : index
      %87 = vector.load %arg9[%c0_39, %c0_40] : memref<8x128xf32, #tpu.memory_space<vmem>>, vector<8x128xf32>
      tpu.vector_store %arg9[%c0_39, %c0_40], %86 {strides = array<i32>} : memref<8x128xf32, #tpu.memory_space<vmem>>, vector<8x128xf32>,
      %c0_41 = arith.constant 0 : index
      %c0_42 = arith.constant 0 : index
      %88 = vector.load %arg10[%c0_41, %c0_42] : memref<8x128xf32, #tpu.memory_space<vmem>>, vector<8x128xf32>
      tpu.vector_store %arg10[%c0_41, %c0_42], %86 {strides = array<i32>} : memref<8x128xf32, #tpu.memory_space<vmem>>, vector<8x128xf32>,
      %cst_43 = arith.constant 0.000000e+00 : f32
      %89 = vector.broadcast %cst_43 : f32 to vector<8x128xf32>
      %c0_44 = arith.constant 0 : index
      %c0_45 = arith.constant 0 : index
      %90 = vector.load %arg11[%c0_44, %c0_45] : memref<8x128xf32, #tpu.memory_space<vmem>>, vector<8x128xf32>
      tpu.vector_store %arg11[%c0_44, %c0_45], %89 {strides = array<i32>} : memref<8x128xf32, #tpu.memory_space<vmem>>, vector<8x128xf32>,
    } else {
    }
    %c0 = arith.constant 0 : index
    %c0_1 = arith.constant 0 : index
    %c0_2 = arith.constant 0 : index
    %4 = vector.load %arg2[%c0, %c0_1, %c0_2] : memref<8x8x128xf32, #tpu.memory_space<vmem>>, vector<8x8x128xf32>
    %c0_3 = arith.constant 0 : index
    %c0_4 = arith.constant 0 : index
    %c0_5 = arith.constant 0 : index
    %5 = vector.load %arg3[%c0_3, %c0_4, %c0_5] : memref<1x8x128xf32, #tpu.memory_space<vmem>>, vector<1x8x128xf32>
    %6 = vector.shape_cast %5 : vector<1x8x128xf32> to vector<8x128xf32>
    %cst = arith.constant 0.000000e+00 : f32
    %7 = vector.broadcast %cst : f32 to vector<8x128xf32>
    %8 = arith.subf %7, %6 : vector<8x128xf32>
    %9 = math.exp %8 : vector<8x128xf32>
    %cst_6 = arith.constant 1.000000e+00 : f32
    %10 = vector.broadcast %cst_6 : f32 to vector<8x128xf32>
    %11 = arith.addf %10, %9 : vector<8x128xf32>
    %cst_7 = arith.constant 1.000000e+00 : f32
    %12 = vector.broadcast %cst_7 : f32 to vector<8x128xf32>
    %13 = arith.divf %12, %11 : vector<8x128xf32>
    %14 = arith.index_cast %arg1 : i32 to index
    %c0_8 = arith.constant 0 : index
    %15 = vector.load %arg5[%14, %c0_8] : memref<8x128xf32, #tpu.memory_space<vmem>>, vector<1x128xf32>
    %cst_9 = arith.constant 0.000000e+00 : f32
    %16 = vector.broadcast %cst_9 : f32 to vector<1x128xf32>
    %17 = arith.cmpf ogt, %15, %16 : vector<1x128xf32>
    %c0_10 = arith.constant 0 : index
    %c0_11 = arith.constant 0 : index
    %18 = vector.load %arg9[%c0_10, %c0_11] : memref<8x128xf32, #tpu.memory_space<vmem>>, vector<8x128xf32>
    %c0_12 = arith.constant 0 : index
    %c0_13 = arith.constant 0 : index
    %19 = vector.load %arg10[%c0_12, %c0_13] : memref<8x128xf32, #tpu.memory_space<vmem>>, vector<8x128xf32>
    %20 = vector.shape_cast %18 : vector<8x128xf32> to vector<8x1x128xf32>
    %21 = vector.broadcast %20 : vector<8x1x128xf32> to vector<8x8x128xf32>
    %22 = arith.addf %21, %4 : vector<8x8x128xf32>
    %cst_14 = arith.constant dense<0xFF800000> : vector<8x128xf32>
    %23 = vector.multi_reduction <maximumf>, %22, %cst_14 [0] : vector<8x8x128xf32> to vector<8x128xf32>
    %24 = vector.shape_cast %23 : vector<8x128xf32> to vector<1x8x128xf32>
    %25 = vector.broadcast %24 : vector<1x8x128xf32> to vector<8x8x128xf32>
    %26 = arith.subf %22, %25 : vector<8x8x128xf32>
    %27 = math.exp %26 : vector<8x8x128xf32>
    %cst_15 = arith.constant dense<0.000000e+00> : vector<8x128xf32>
    %28 = vector.multi_reduction <add>, %27, %cst_15 [0] : vector<8x8x128xf32> to vector<8x128xf32>
    %29 = math.log %28 : vector<8x128xf32>
    %30 = arith.addf %23, %29 : vector<8x128xf32>
    %31 = arith.addf %30, %13 : vector<8x128xf32>
    %32 = vector.shape_cast %17 : vector<1x128xi1> to vector<1x128xi1>
    %33 = vector.broadcast %32 : vector<1x128xi1> to vector<8x128xi1>
    %34 = arith.select %33, %31, %18 : vector<8x128xi1>, vector<8x128xf32>
    %c0_16 = arith.constant 0 : index
    %c0_17 = arith.constant 0 : index
    %35 = vector.load %arg9[%c0_16, %c0_17] : memref<8x128xf32, #tpu.memory_space<vmem>>, vector<8x128xf32>
    tpu.vector_store %arg9[%c0_16, %c0_17], %34 {strides = array<i32>} : memref<8x128xf32, #tpu.memory_space<vmem>>, vector<8x128xf32>,
    %36 = vector.shape_cast %19 : vector<8x128xf32> to vector<8x1x128xf32>
    %37 = vector.broadcast %36 : vector<8x1x128xf32> to vector<8x8x128xf32>
    %38 = arith.addf %37, %4 : vector<8x8x128xf32>
    %cst_18 = arith.constant dense<0xFF800000> : vector<8x128xf32>
    %39 = vector.multi_reduction <maximumf>, %38, %cst_18 [0] : vector<8x8x128xf32> to vector<8x128xf32>
    %40 = tpu.iota {dimensions = array<i32: 0>} : vector<8x8x128xi32>
    %41 = vector.shape_cast %39 : vector<8x128xf32> to vector<1x8x128xf32>
    %42 = vector.broadcast %41 : vector<1x8x128xf32> to vector<8x8x128xf32>
    %43 = arith.cmpf oge, %38, %42 : vector<8x8x128xf32>
    %c8_i32 = arith.constant 8 : i32
    %44 = vector.broadcast %c8_i32 : i32 to vector<8x8x128xi32>
    %45 = arith.select %43, %40, %44 : vector<8x8x128xi1>, vector<8x8x128xi32>
    %cst_19 = arith.constant dense<2147483647> : vector<8x128xi32>
    %46 = vector.multi_reduction <minsi>, %45, %cst_19 [0] : vector<8x8x128xi32> to vector<8x128xi32>
    %47 = vector.shape_cast %46 : vector<8x128xi32> to vector<1x8x128xi32>
    %c0_20 = arith.constant 0 : index
    %c0_21 = arith.constant 0 : index
    %c0_22 = arith.constant 0 : index
    %48 = vector.load %arg7[%c0_20, %c0_21, %c0_22] : memref<1x8x128xi32, #tpu.memory_space<vmem>>, vector<1x8x128xi32>
    tpu.vector_store %arg7[%c0_20, %c0_21, %c0_22], %47 {strides = array<i32>} : memref<1x8x128xi32, #tpu.memory_space<vmem>>, vector<1x8x128xi32>,
    %49 = arith.addf %39, %13 : vector<8x128xf32>
    %50 = vector.shape_cast %17 : vector<1x128xi1> to vector<1x128xi1>
    %51 = vector.broadcast %50 : vector<1x128xi1> to vector<8x128xi1>
    %52 = arith.select %51, %49, %19 : vector<8x128xi1>, vector<8x128xf32>
    %c0_23 = arith.constant 0 : index
    %c0_24 = arith.constant 0 : index
    %53 = vector.load %arg10[%c0_23, %c0_24] : memref<8x128xf32, #tpu.memory_space<vmem>>, vector<8x128xf32>
    tpu.vector_store %arg10[%c0_23, %c0_24], %52 {strides = array<i32>} : memref<8x128xf32, #tpu.memory_space<vmem>>, vector<8x128xf32>,
    %54 = arith.index_cast %arg1 : i32 to index
    %c0_25 = arith.constant 0 : index
    %55 = vector.load %arg4[%54, %c0_25] : memref<9x128xi32, #tpu.memory_space<vmem>>, vector<1x128xi32>
    %c1_i32 = arith.constant 1 : i32
    %56 = arith.addi %arg1, %c1_i32 : i32
    %57 = arith.index_cast %56 : i32 to index
    %c0_26 = arith.constant 0 : index
    %58 = vector.load %arg4[%57, %c0_26] : memref<9x128xi32, #tpu.memory_space<vmem>>, vector<1x128xi32>
    %59 = vector.broadcast %55 : vector<1x128xi32> to vector<8x128xi32>
    %60 = arith.cmpi eq, %59, %0 : vector<8x128xi32>
    %61 = vector.broadcast %58 : vector<1x128xi32> to vector<8x128xi32>
    %62 = arith.cmpi eq, %61, %0 : vector<8x128xi32>
    %63 = vector.shape_cast %60 : vector<8x128xi1> to vector<8x1x128xi1>
    %cst_27 = arith.constant 0.000000e+00 : f32
    %64 = vector.shape_cast %63 : vector<8x1x128xi1> to vector<8x1x128xi1>
    %65 = vector.broadcast %64 : vector<8x1x128xi1> to vector<8x8x128xi1>
    %66 = vector.broadcast %cst_27 : f32 to vector<8x8x128xf32>
    %67 = arith.select %65, %4, %66 : vector<8x8x128xi1>, vector<8x8x128xf32>
    %cst_28 = arith.constant dense<0.000000e+00> : vector<8x128xf32>
    %68 = vector.multi_reduction <add>, %67, %cst_28 [0] : vector<8x8x128xf32> to vector<8x128xf32>
    %c7_i32 = arith.constant 7 : i32
    %69 = arith.cmpi slt, %arg1, %c7_i32 : i32
    %70 = vector.broadcast %69 : i1 to vector<1x128xi1>
    %71 = arith.andi %17, %70 : vector<1x128xi1>
    %c0_29 = arith.constant 0 : index
    %c0_30 = arith.constant 0 : index
    %72 = vector.load %arg11[%c0_29, %c0_30] : memref<8x128xf32, #tpu.memory_space<vmem>>, vector<8x128xf32>
    %73 = vector.broadcast %71 : vector<1x128xi1> to vector<8x128xi1>
    %74 = arith.andi %62, %73 : vector<8x128xi1>
    %cst_31 = arith.constant 0.000000e+00 : f32
    %75 = vector.broadcast %cst_31 : f32 to vector<8x128xf32>
    %76 = arith.select %74, %68, %75 : vector<8x128xi1>, vector<8x128xf32>
    %77 = arith.addf %72, %76 : vector<8x128xf32>
    %c0_32 = arith.constant 0 : index
    %c0_33 = arith.constant 0 : index
    %78 = vector.load %arg11[%c0_32, %c0_33] : memref<8x128xf32, #tpu.memory_space<vmem>>, vector<8x128xf32>
    tpu.vector_store %arg11[%c0_32, %c0_33], %77 {strides = array<i32>} : memref<8x128xf32, #tpu.memory_space<vmem>>, vector<8x128xf32>,
    %c7_i32_34 = arith.constant 7 : i32
    %79 = arith.cmpi eq, %arg1, %c7_i32_34 : i32
    %80 = arith.extui %79 : i1 to i32
    %c0_i32_35 = arith.constant 0 : i32
    %81 = arith.cmpi ne, %80, %c0_i32_35 : i32
    scf.if %81 {
      %82 = vector.extract_strided_slice %4 {offsets = [0, 2, 0], sizes = [8, 1, 128], strides = [1, 1, 1]} : vector<8x8x128xf32> to vector<8x1x128xf32>
      %83 = vector.shape_cast %82 : vector<8x1x128xf32> to vector<8x128xf32>
      %84 = vector.extract_strided_slice %4 {offsets = [0, 0, 0], sizes = [8, 1, 128], strides = [1, 1, 1]} : vector<8x8x128xf32> to vector<8x1x128xf32>
      %85 = vector.shape_cast %84 : vector<8x1x128xf32> to vector<8x128xf32>
      %86 = arith.addf %34, %83 : vector<8x128xf32>
      %cst_36 = arith.constant dense<0xFF800000> : vector<128xf32>
      %87 = vector.multi_reduction <maximumf>, %86, %cst_36 [0] : vector<8x128xf32> to vector<128xf32>
      %88 = vector.shape_cast %87 : vector<128xf32> to vector<1x128xf32>
      %89 = vector.broadcast %88 : vector<1x128xf32> to vector<8x128xf32>
      %90 = arith.subf %86, %89 : vector<8x128xf32>
      %91 = math.exp %90 : vector<8x128xf32>
      %cst_37 = arith.constant dense<0.000000e+00> : vector<128xf32>
      %92 = vector.multi_reduction <add>, %91, %cst_37 [0] : vector<8x128xf32> to vector<128xf32>
      %93 = vector.shape_cast %92 : vector<128xf32> to vector<1x128xf32>
      %94 = math.log %93 : vector<1x128xf32>
      %95 = arith.addf %88, %94 : vector<1x128xf32>
      %96 = arith.addf %52, %83 : vector<8x128xf32>
      %cst_38 = arith.constant dense<0xFF800000> : vector<128xf32>
      %97 = vector.multi_reduction <maximumf>, %96, %cst_38 [0] : vector<8x128xf32> to vector<128xf32>
      %98 = vector.shape_cast %97 : vector<128xf32> to vector<1x128xf32>
      %99 = vector.broadcast %98 : vector<1x128xf32> to vector<8x128xf32>
      %100 = arith.cmpf oge, %96, %99 : vector<8x128xf32>
      %c8_i32_39 = arith.constant 8 : i32
      %101 = vector.broadcast %c8_i32_39 : i32 to vector<8x128xi32>
      %102 = arith.select %100, %0, %101 : vector<8x128xi1>, vector<8x128xi32>
      %cst_40 = arith.constant dense<2147483647> : vector<128xi32>
      %103 = vector.multi_reduction <minsi>, %102, %cst_40 [0] : vector<8x128xi32> to vector<128xi32>
      %104 = vector.shape_cast %103 : vector<128xi32> to vector<1x128xi32>
      %c0_41 = arith.constant 0 : index
      %c0_42 = arith.constant 0 : index
      %105 = vector.load %arg5[%c0_41, %c0_42] : memref<8x128xf32, #tpu.memory_space<vmem>>, vector<8x128xf32>
      %cst_43 = arith.constant dense<0.000000e+00> : vector<128xf32>
      %106 = vector.multi_reduction <add>, %105, %cst_43 [0] : vector<8x128xf32> to vector<128xf32>
      %107 = vector.shape_cast %106 : vector<128xf32> to vector<1x128xf32>
      %108 = arith.fptosi %107 : vector<1x128xf32> to vector<1x128xi32>
      %c0_44 = arith.constant 0 : index
      %c0_45 = arith.constant 0 : index
      %109 = vector.load %arg4[%c0_44, %c0_45] : memref<9x128xi32, #tpu.memory_space<vmem>>, vector<9x128xi32>
      %110 = tpu.iota {dimensions = array<i32: 0>} : vector<9x128xi32>
      %111 = vector.broadcast %108 : vector<1x128xi32> to vector<9x128xi32>
      %112 = arith.cmpi eq, %110, %111 : vector<9x128xi32>
      %c0_i32_46 = arith.constant 0 : i32
      %113 = vector.broadcast %c0_i32_46 : i32 to vector<9x128xi32>
      %114 = arith.select %112, %109, %113 : vector<9x128xi1>, vector<9x128xi32>
      %cst_47 = arith.constant dense<0> : vector<128xi32>
      %115 = vector.multi_reduction <add>, %114, %cst_47 [0] : vector<9x128xi32> to vector<128xi32>
      %116 = vector.shape_cast %115 : vector<128xi32> to vector<1x128xi32>
      %117 = vector.broadcast %116 : vector<1x128xi32> to vector<8x128xi32>
      %118 = arith.cmpi eq, %0, %117 : vector<8x128xi32>
      %cst_48 = arith.constant 0.000000e+00 : f32
      %119 = vector.broadcast %cst_48 : f32 to vector<8x128xf32>
      %120 = arith.select %118, %85, %119 : vector<8x128xi1>, vector<8x128xf32>
      %cst_49 = arith.constant dense<0.000000e+00> : vector<128xf32>
      %121 = vector.multi_reduction <add>, %120, %cst_49 [0] : vector<8x128xf32> to vector<128xf32>
      %122 = vector.shape_cast %121 : vector<128xf32> to vector<1x128xf32>
      %cst_50 = arith.constant dense<0.000000e+00> : vector<128xf32>
      %123 = vector.multi_reduction <add>, %77, %cst_50 [0] : vector<8x128xf32> to vector<128xf32>
      %124 = vector.shape_cast %123 : vector<128xf32> to vector<1x128xf32>
      %125 = arith.addf %124, %122 : vector<1x128xf32>
      %126 = tpu.concatenate %95, %125, %98 in 0 : vector<1x128xf32>, vector<1x128xf32>, vector<1x128xf32> -> vector<3x128xf32>
      %c0_51 = arith.constant 0 : index
      %c0_52 = arith.constant 0 : index
      %127 = vector.load %arg6[%c0_51, %c0_52] : memref<3x128xf32, #tpu.memory_space<vmem>>, vector<3x128xf32>
      tpu.vector_store %arg6[%c0_51, %c0_52], %126 {strides = array<i32>} : memref<3x128xf32, #tpu.memory_space<vmem>>, vector<3x128xf32>,
      %c0_53 = arith.constant 0 : index
      %c0_54 = arith.constant 0 : index
      %128 = vector.load %arg8[%c0_53, %c0_54] : memref<1x128xi32, #tpu.memory_space<vmem>>, vector<1x128xi32>
      tpu.vector_store %arg8[%c0_53, %c0_54], %104 {strides = array<i32>} : memref<1x128xi32, #tpu.memory_space<vmem>>, vector<1x128xi32>,
    } else {
    }
    return
  }
  func.func @transform_0(%arg0: i32, %arg1: i32) -> (i32, i32, i32) {
    %c0_i32 = arith.constant 0 : i32
    %c0_i32_0 = arith.constant 0 : i32
    %c0_i32_1 = arith.constant 0 : i32
    %c0_i32_2 = arith.constant 0 : i32
    return %c0_i32, %c0_i32_0, %c0_i32_1 : i32, i32, i32
  }
  func.func @transform_1(%arg0: i32, %arg1: i32) -> (i32, i32, i32) {
    %c0_i32 = arith.constant 0 : i32
    %c0_i32_0 = arith.constant 0 : i32
    return %arg1, %c0_i32, %arg0 : i32, i32, i32
  }
  func.func @transform_2(%arg0: i32, %arg1: i32) -> (i32, i32) {
    %c0_i32 = arith.constant 0 : i32
    %c0_i32_0 = arith.constant 0 : i32
    return %c0_i32, %arg0 : i32, i32
  }
  func.func @transform_3(%arg0: i32, %arg1: i32) -> (i32, i32) {
    %c0_i32 = arith.constant 0 : i32
    %c0_i32_0 = arith.constant 0 : i32
    return %c0_i32, %arg0 : i32, i32
  }
  func.func @transform_4(%arg0: i32, %arg1: i32) -> (i32, i32) {
    %c0_i32 = arith.constant 0 : i32
    %c0_i32_0 = arith.constant 0 : i32
    return %c0_i32, %arg0 : i32, i32
  }
  func.func @transform_5(%arg0: i32, %arg1: i32) -> (i32, i32, i32) {
    %c0_i32 = arith.constant 0 : i32
    %c0_i32_0 = arith.constant 0 : i32
    return %arg1, %c0_i32, %arg0 : i32, i32, i32
  }
  func.func @transform_6(%arg0: i32, %arg1: i32) -> (i32, i32) {
    %c0_i32 = arith.constant 0 : i32
    %c0_i32_0 = arith.constant 0 : i32
    return %c0_i32, %arg0 : i32, i32
  }
}

</mosaic_0001>

<bundles_post_ra>
// kernel: crf_forward_device.1
= control target key start
LH: loop header
LB: loop body
LE: loop exit
PB: predicated region body
PF: predicated region fallthrough
CT: control target
= control target key end

     0   :  { %s1031_s21 = smov 0   ;;  %s1033_s22 = smov 0   ;;  %s1363_s0 = inlined_call_operand.vmem [shape: f32[8,8,128], index: 0, kind: input, shape index: {}]   ;;  %s1364_s1 = inlined_call_operand.vmem [shape: f32[8,8,128], index: 1, kind: input, shape index: {}]   ;;  %s1365_s2 = inlined_call_operand.vmem [shape: s32[9,128], index: 2, kind: input, shape index: {}]   ;;  %s1366_s3 = inlined_call_operand.vmem [shape: f32[8,128], index: 3, kind: input, shape index: {}]   ;;  %s1367_s4 = inlined_call_operand.vmem [shape: f32[3,128], index: 4, kind: output, shape index: {0}]   ;;  %s1368_s5 = inlined_call_operand.vmem [shape: s32[8,8,128], index: 5, kind: output, shape index: {1}]   ;;  %s1369_s6 = inlined_call_operand.vmem [shape: s32[1,128], index: 6, kind: output, shape index: {2}]  }
   0x1   :  { %s1035_s23 = smov 0  }
   0x2 LB: > { %s26_s24 = sadd.s32 1, %s986_s22  ;;  %p897_p0 = scmp.ge.s32.totalorder %s990_s23, 1  ;;  %s990_s23 = sphi %s1035_s23, %s17_s23   ;;  %s986_s22 = sphi %s1033_s22, %s1381_s22   ;;  %s982_s21 = sphi %s1031_s21, %s1380_s21  }
   0x3   : > { %p27_p1 = scmp.ge.s32.totalorder %s26_s24, 8  ;;  %p253_p2 = scmp.lt.s32.totalorder %s990_s23, 9 }
   0x5   : > { %s1383_s24 = smov (%p27_p1, %s26_s24), 0  ;;  %p254_p3 = pnand %p897_p0, %p253_p2 }
   0x6   : > { %p302_p4 = scmp.lt.s32.totalorder (!%p254_p3), %s982_s21, 7  ;;  %p900_p5 = scmp.ne.s32.totalorder (!%p254_p3), %s982_s21, 0 }
   0x7   : > { %257 = sbr.rel (%p254_p3) target bundleno = 151 (0x97), region = 36 }
   0xc   : > { %v331_v0 = vlaneseq  ;;  %s303_s25 = scalar_select %p302_p4, %s982_s21, 7 }
   0xd   : > { %336 = sbr.rel (%p900_p5) target bundleno = 22 (0x16), region = 40 }
   0xe   : > { %v1055_v1 = vshrl.u32 %v331_v0, 7  ;;  %s898_s26 = sshll.u32 %s303_s25, 3 }
   0xf   : > { %s308_s29 = scalar_lea.vmem %s1364_s1, %s898_s26  ;;  %s1063_s8 = scalar_lea.vmem %s1368_s5, %s898_s26 }
  0x12   : > { %vm337_vm0 = vcmp.eq.s32.totalorder %v1055_v1, 1  ;;  %v992_v2 = vmov -10000.0   ;;  %v993_v4 = vmov 0.0  }
  0x13   : > { %v338_v3 = vsel %vm337_vm0, 0.0, %v992_v2  ;;  %341 = vst [vmem:[#allocation4] sm:$0xff] %v993_v4 }
  0x14   : > { %339 = vst [vmem:[#allocation2] sm:$0xff] %v338_v3 }
  0x15   : > { %340 = vst [vmem:[#allocation3] sm:$0xff] %v338_v3 }
  0x16 PF: > { %v350_v5 = vld [vmem:[%s308_s29] sm:$0xff]  ;;  %s1071_s11 = scalar_lea.vmem %s1365_s2, %s982_s21  ;;  %v1081_v7 = vld [vmem:[%s1363_s0 + $0x8] sm:$0xff]  ;;  %v1088_v10 = vld [vmem:[%s1363_s0 + $0x10] sm:$0xff]  ;;  %s370_s12 = scalar_lea.vmem %s1366_s3, %s982_s21 }
  0x17   : > { %v1076_v6 = vld [vmem:[%s1363_s0] sm:$0xff]  ;;  %v351_v8 = vsub.f32 0.0, %v350_v5  ;;  %v1096_v14 = vld [vmem:[%s1363_s0 + $0x18] sm:$0xff]  ;;  %v1109_v20 = vld [vmem:[%s1363_s0 + $0x28] sm:$0xff]  ;;  %s1232_s13 = scalar_select %p302_p4, 1, 0 }
  0x18   : > { %v1104_v19 = vld [vmem:[%s1363_s0 + $0x20] sm:$0xff]  ;;  %v1116_v25 = vld [vmem:[%s1363_s0 + $0x30] sm:$0xff]  ;;  %v1121_v26 = vld [vmem:[%s1363_s0 + $0x38] sm:$0xff]  ;;  %p902_p6 = scmp.ne.s32.totalorder %s982_s21, 7 }
  0x19   : > { %v352_v15 = vmul.f32 1.442695, %v351_v8  ;;  %v1141_v45 = vld [vmem:[%s370_s12] sm:$0x1] }
  0x1a   : > { %vm372_vm1 = vcmp.gt.f32.partialorder %v1141_v45, 0.0 }
  0x1b   : > { %v1083_v9 = vld [vmem:[#allocation2] sm:$0xff]  ;;  %942 = vpow2.f32 %v352_v15 }
  0x1c   : > { %v376_v11 = vrot.slane %v1083_v9, 1  ;;  %v377_v12 = vrot.slane %v1083_v9, 2  ;;  %v378_v13 = vrot.slane %v1083_v9, 3  ;;  %v379_v16 = vrot.slane %v1083_v9, 4  ;;  %v1125_v34 = vld [vmem:[#allocation3] sm:$0xff] }
  0x1d   : > { %v380_v17 = vrot.slane %v1083_v9, 5  ;;  %v381_v18 = vrot.slane %v1083_v9, 6  ;;  %v382_v21 = vrot.slane %v1083_v9, 7  ;;  %v383_v22 = vperm.slane %v1083_v9, 0 }
  0x1e   : > { %v384_v23 = vperm.slane %v376_v11, 0  ;;  %v385_v24 = vperm.slane %v377_v12, 0  ;;  %v386_v27 = vperm.slane %v378_v13, 0  ;;  %v387_v28 = vperm.slane %v379_v16, 0 }
  0x1f   : > { %v388_v29 = vperm.slane %v380_v17, 0  ;;  %v389_v30 = vperm.slane %v381_v18, 0  ;;  %v390_v31 = vperm.slane %v382_v21, 0  ;;  %v399_v32 = vadd.f32 %v383_v22, %v1076_v6 }
  0x20   : > { %v400_v33 = vadd.f32 %v384_v23, %v1081_v7  ;;  %v401_v35 = vadd.f32 %v385_v24, %v1088_v10  ;;  %v402_v36 = vadd.f32 %v386_v27, %v1096_v14  ;;  %v403_v37 = vadd.f32 %v387_v28, %v1104_v19 }
  0x21   : > { %v404_v38 = vadd.f32 %v388_v29, %v1109_v20  ;;  %v405_v39 = vadd.f32 %v389_v30, %v1116_v25  ;;  %v1137_v40 = vadd.f32 %v390_v31, %v1121_v26  ;;  %v455_v43 = vrot.slane %v1125_v34, 1  ;;  %v943_v50 = vpop.eup %942 }
  0x22   : > { %v407_v41 = vmax.f32 %v399_v32, %v403_v37  ;;  %v456_v44 = vrot.slane %v1125_v34, 2  ;;  %v457_v48 = vrot.slane %v1125_v34, 3  ;;  %v458_v49 = vrot.slane %v1125_v34, 4 }
  0x23   : > { %v408_v42 = vmax.f32 %v400_v33, %v404_v38  ;;  %v409_v46 = vmax.f32 %v401_v35, %v405_v39  ;;  %v410_v47 = vmax.f32 %v402_v36, %v1137_v40  ;;  %v459_v52 = vrot.slane %v1125_v34, 5 }
  0x24   : > { %v460_v53 = vrot.slane %v1125_v34, 6  ;;  %v461_v54 = vrot.slane %v1125_v34, 7  ;;  %v1149_v55 = vadd.f32 1.0, %v943_v50  ;;  %v462_v57 = vperm.slane %v1125_v34, 0 }
  0x25   : > { %v411_v51 = vmax.f32 %v407_v41, %v408_v42  ;;  %v412_v56 = vmax.f32 %v409_v46, %v410_v47  ;;  %v463_v58 = vperm.slane %v455_v43, 0  ;;  %v464_v59 = vperm.slane %v456_v44, 0  ;;  %v940_v42 = vld [vmem:[%s1071_s11] ss:$0 sm:$0xff] }
  0x26   : > { %944 = vrcp.f32 %v1149_v55  ;;  %v465_v60 = vperm.slane %v457_v48, 0  ;;  %v466_v61 = vperm.slane %v458_v49, 0  ;;  %v467_v63 = vperm.slane %v459_v52, 0 }
  0x27   : > { %v1154_v62 = vmax.f32 %v411_v51, %v412_v56  ;;  %v468_v0 = vperm.slane %v460_v53, 0  ;;  %v469_v2 = vperm.slane %v461_v54, 0  ;;  %vm360_vm2 = vweird.f32 %v1149_v55 }
  0x28   : > { %v364_v3 = vand.u32 2147483647, %v1149_v55  ;;  %v366_v4 = vand.u32 2147483648, %v1149_v55  ;;  %v1160_v5 = vadd.f32 %v462_v57, %v1076_v6  ;;  %v1169_v17 = vadd.f32 %v463_v58, %v1081_v7 }
  0x29   : > { %v414_v8 = vsub.f32 %v399_v32, %v1154_v62  ;;  %v415_v11 = vsub.f32 %v400_v33, %v1154_v62  ;;  %v416_v12 = vsub.f32 %v401_v35, %v1154_v62  ;;  %v417_v13 = vsub.f32 %v402_v36, %v1154_v62 }
  0x2a   : > { %v418_v15 = vsub.f32 %v403_v37, %v1154_v62  ;;  %v419_v16 = vsub.f32 %v404_v38, %v1154_v62  ;;  %v1172_v18 = vadd.f32 %v464_v59, %v1088_v10  ;;  %v420_v21 = vsub.f32 %v405_v39, %v1154_v62 }
  0x2b   : > { %v422_v22 = vmul.f32 1.442695, %v414_v8  ;;  %v424_v23 = vmul.f32 1.442695, %v415_v11  ;;  %v426_v24 = vmul.f32 1.442695, %v416_v12  ;;  %v421_v28 = vsub.f32 %v1137_v40, %v1154_v62 }
  0x2c   : > { %v945_v27 = vpop.eup %944  ;;  %v428_v29 = vmul.f32 1.442695, %v417_v13  ;;  %v1178_v30 = vadd.f32 %v465_v60, %v1096_v14  ;;  %v1181_v31 = vadd.f32 %v466_v61, %v1104_v19  ;;  %v430_v33 = vmul.f32 1.442695, %v418_v15 }
  0x2d   : > { %v356_v32 = vmul.f32 %v945_v27, %v1149_v55  ;;  %946 = vpow2.f32 %v422_v22  ;;  %v432_v35 = vmul.f32 1.442695, %v419_v16  ;;  %vm361_vm3 = vweird.f32 %v945_v27 }
  0x2e   : > { %948 = vpow2.f32 %v424_v23  ;;  %v994_v36 = vmov 0   ;;  %v1188_v38 = vadd.f32 %v467_v63, %v1109_v20  ;;  %v434_v40 = vmul.f32 1.442695, %v420_v21  ;;  %vm1201_vm4 = vmor %vm360_vm2, %vm361_vm3 }
  0x2f   : > { %v449_v37 = vsel %vm372_vm1, 1, %v994_v36  ;;  %v357_v39 = vsub.f32 1.0, %v356_v32  ;;  %950 = vpow2.f32 %v426_v24  ;;  %v484_v41 = vadd.f32 %v468_v0, %v1116_v25 }
  0x30   : > { %952 = vpow2.f32 %v428_v29  ;;  %v485_v43 = vadd.f32 %v469_v2, %v1121_v26  ;;  %v486_v44 = vmax.f32 %v1160_v5, %v1181_v31  ;;  %v487_v46 = vmax.f32 %v1169_v17, %v1188_v38 }
  0x31   : > { %v358_v47 = vmul.f32 %v945_v27, %v357_v39  ;;  %v436_v48 = vmul.f32 1.442695, %v421_v28  ;;  %v450_v49 = vperm.slane %v449_v37, 0  ;;  %v488_v50 = vmax.f32 %v1172_v18, %v484_v41 }
  0x32   : > { %v367_v52 = vor.u32 1.1754944e-38, %v366_v4  ;;  %954 = vpow2.f32 %v430_v33  ;;  %v489_v53 = vmax.f32 %v1178_v30, %v485_v43  ;;  %v490_v54 = vmax.f32 %v486_v44, %v487_v46 }
  0x33   : > { %v947_v56 = vpop.eup %946  ;;  %v359_v57 = vadd.f32 %v945_v27, %v358_v47  ;;  %vm365_vm5 = vcmp.eq.f32.partialorder %v364_v3, 8.507059e+37  ;;  %956 = vpow2.f32 %v432_v35  ;;  %vm533_vm6 = vcmp.eq.s32.totalorder %v940_v42, %v1055_v1 }
  0x34   : > { %v949_v58 = vpop.eup %948  ;;  %958 = vpow2.f32 %v434_v40  ;;  %v491_v59 = vmax.f32 %v488_v50, %v489_v53  ;;  %v1208_v55 = vsel %vm533_vm6, 1, %v994_v36  ;;  %vm1212_vm7 = vcmp.eq.s32.totalorder %v450_v49, 1 }
  0x35   : > { %v951_v60 = vpop.eup %950  ;;  %v363_v61 = vsel %vm1201_vm4, %v945_v27, %v359_v57  ;;  %960 = vpow2.f32 %v436_v48  ;;  %v438_v63 = vadd.f32 %v949_v58, %v947_v56  ;;  %v537_v2 = vrot.slane %v1208_v55, 1 }
  0x36   : > { %v953_v3 = vpop.eup %952  ;;  %v1217_v4 = vsel %vm365_vm5, %v367_v52, %v363_v61  ;;  %v492_v8 = vmax.f32 %v490_v54, %v491_v59  ;;  %v538_v11 = vrot.slane %v1208_v55, 2  ;;  %v539_v12 = vrot.slane %v1208_v55, 3 }
  0x37   : > { %v439_v13 = vadd.f32 %v951_v60, %v438_v63  ;;  %v540_v15 = vrot.slane %v1208_v55, 4  ;;  %v541_v16 = vrot.slane %v1208_v55, 5  ;;  %v542_v21 = vrot.slane %v1208_v55, 6 }
  0x38   : > { %v955_v22 = vpop.eup %954  ;;  %vm493_vm8 = vcmp.ge.f32.partialorder %v1160_v5, %v492_v8  ;;  %vm494_vm9 = vcmp.ge.f32.partialorder %v1169_v17, %v492_v8  ;;  %vm495_vm10 = vcmp.ge.f32.partialorder %v1172_v18, %v492_v8  ;;  %vm496_vm11 = vcmp.ge.f32.partialorder %v1178_v30, %v492_v8 }
  0x39   : > { %v957_v23 = vpop.eup %956  ;;  %v440_v24 = vadd.f32 %v953_v3, %v439_v13  ;;  %vm497_vm12 = vcmp.ge.f32.partialorder %v1181_v31, %v492_v8  ;;  %vm498_vm13 = vcmp.ge.f32.partialorder %v1188_v38, %v492_v8  ;;  %vm499_vm14 = vcmp.ge.f32.partialorder %v484_v41, %v492_v8 }
  0x3a   : > { %v959_v27 = vpop.eup %958  ;;  %vm500_vm15 = vcmp.ge.f32.partialorder %v485_v43, %v492_v8  ;;  %v995_v28 = vmov 8   ;;  %v524_v42 = vadd.f32 %v492_v8, %v1217_v4  ;;  %vm544_vm6 = vcmp.ne.s32.totalorder %v537_v2, 0 }
  0x3b   : > { %v501_v29 = vsel %vm493_vm8, 0, %v995_v28  ;;  %v502_v32 = vsel %vm494_vm9, 1, %v995_v28  ;;  %v503_v5 = vsel %vm495_vm10, 2, %v995_v28  ;;  %v961_v33 = vpop.eup %960  ;;  %v441_v17 = vadd.f32 %v955_v22, %v440_v24 }
  0x3c   : > { %v504_v35 = vsel %vm496_vm11, 3, %v995_v28  ;;  %v505_v18 = vsel %vm497_vm12, 4, %v995_v28  ;;  %v506_v37 = vsel %vm498_vm13, 5, %v995_v28  ;;  %v507_v30 = vsel %vm499_vm14, 6, %v995_v28 }
  0x3d   : > { %v508_v39 = vsel %vm500_vm15, 7, %v995_v28  ;;  %vm509_vm0 = vcmp.lt.s32.totalorder %v501_v29, %v505_v18  ;;  %vm511_vm2 = vcmp.lt.s32.totalorder %v502_v32, %v506_v37  ;;  %v442_v31 = vadd.f32 %v957_v23, %v441_v17  ;;  %v941_v17 = vld [vmem:[%s1071_s11 + $0x1] ss:$0 sm:$0xff] }
  0x3e   : > { %v510_v38 = vsel %vm509_vm0, %v501_v29, %v505_v18  ;;  %v512_v40 = vsel %vm511_vm2, %v502_v32, %v506_v37  ;;  %vm513_vm3 = vcmp.lt.s32.totalorder %v503_v5, %v507_v30  ;;  %vm515_vm4 = vcmp.lt.s32.totalorder %v504_v35, %v508_v39 }
  0x3f   : > { %v514_v41 = vsel %vm513_vm3, %v503_v5, %v507_v30  ;;  %vm517_vm5 = vcmp.lt.s32.totalorder %v510_v38, %v512_v40  ;;  %v443_v43 = vadd.f32 %v959_v27, %v442_v31  ;;  %v516_v44 = vsel %vm515_vm4, %v504_v35, %v508_v39 }
  0x40   : > { %v518_v46 = vsel %vm517_vm5, %v510_v38, %v512_v40  ;;  %vm519_vm8 = vcmp.lt.s32.totalorder %v514_v41, %v516_v44  ;;  %v1238_v47 = vsel %vm1212_vm7, %v524_v42, %v1125_v34  ;;  %vm545_vm9 = vcmp.ne.s32.totalorder %v538_v11, 0  ;;  %v594_v40 = vld [vmem:[#allocation4] sm:$0xff] }
  0x41   : > { %vm546_vm10 = vcmp.ne.s32.totalorder %v539_v12, 0  ;;  %v444_v48 = vadd.f32 %v961_v33, %v443_v43  ;;  %v591_v49 = vstv %s1232_s13  ;;  %v520_v50 = vsel %vm519_vm8, %v514_v41, %v516_v44  ;;  %526 = vst [vmem:[#allocation3] sm:$0xff] %v1238_v47 }
  0x42   : > { %vm547_vm11 = vcmp.ne.s32.totalorder %v540_v15, 0  ;;  %vm521_vm12 = vcmp.lt.s32.totalorder %v518_v46, %v520_v50  ;;  %v543_v51 = vrot.slane %v1208_v55, 7  ;;  %vm548_vm13 = vcmp.ne.s32.totalorder %v541_v16, 0 }
  0x43   : > { %v551_v52 = vsel %vm544_vm6, 1, %v994_v36  ;;  %962 = vlog2.f32 %v444_v48  ;;  %v522_v53 = vsel %vm521_vm12, %v518_v46, %v520_v50  ;;  %v552_v34 = vsel %vm545_vm9, 1, %v994_v36 }
  0x44   : > { %v553_v54 = vsel %vm546_vm10, 1, %v994_v36  ;;  %523 = vst [vmem:[%s1063_s8] sm:$0xff] %v522_v53  ;;  %vm549_vm14 = vcmp.ne.s32.totalorder %v542_v21, 0  ;;  %v554_v56 = vsel %vm547_vm11, 1, %v994_v36  ;;  %v558_v57 = vperm.slane %v1208_v55, 0 }
  0x45   : > { %v559_v58 = vperm.slane %v551_v52, 0  ;;  %v560_v59 = vperm.slane %v552_v34, 0  ;;  %v561_v60 = vperm.slane %v553_v54, 0  ;;  %vm592_vm15 = vcmp.eq.s32.totalorder %v591_v49, 1 }
  0x46   : > { %vm550_vm0 = vcmp.ne.s32.totalorder %v543_v51, 0  ;;  %v555_v61 = vsel %vm548_vm13, 1, %v994_v36  ;;  %v562_v63 = vperm.slane %v554_v56, 0  ;;  %vm566_vm2 = vcmp.eq.s32.totalorder %v558_v57, 1  ;;  %vm593_vm5 = vmand %vm372_vm1, %vm592_vm15 }
  0x47   : > { %vm567_vm3 = vcmp.eq.s32.totalorder %v559_v58, 1  ;;  %vm1250_vm4 = vcmp.eq.s32.totalorder %v560_v59, 1  ;;  %v556_v3 = vsel %vm549_vm14, 1, %v994_v36  ;;  %v563_v55 = vperm.slane %v555_v61, 0 }
  0x48   : > { %vm1257_vm6 = vcmp.eq.s32.totalorder %v561_v60, 1  ;;  %v574_v12 = vsel %vm566_vm2, %v1076_v6, 0.0  ;;  %v575_v13 = vsel %vm567_vm3, %v1081_v7, 0.0  ;;  %v557_v16 = vsel %vm550_vm0, 1, %v994_v36 }
  0x49   : > { %v963_v8 = vpop.eup %962  ;;  %v576_v21 = vsel %vm1250_vm4, %v1088_v10, 0.0  ;;  %v564_v22 = vperm.slane %v556_v3, 0  ;;  %vm1267_vm8 = vcmp.eq.s32.totalorder %v562_v63, 1  ;;  %v582_v23 = vadd.f32 %v575_v13, %v574_v12 }
  0x4a   : > { %v446_v15 = vmul.f32 0.6931472, %v963_v8  ;;  %v577_v27 = vsel %vm1257_vm6, %v1096_v14, 0.0  ;;  %v595_v28 = vsel %vm593_vm5, 1, %v994_v36  ;;  %v565_v29 = vperm.slane %v557_v16, 0 }
  0x4b   : > { %vm571_vm1 = vcmp.eq.s32.totalorder %v563_v55, 1  ;;  %v583_v32 = vadd.f32 %v582_v23, %v576_v21  ;;  %v578_v33 = vsel %vm1267_vm8, %v1104_v19, 0.0  ;;  %vm572_vm9 = vcmp.eq.s32.totalorder %v564_v22, 1 }
  0x4c   : > { %v447_v24 = vadd.f32 %v446_v15, %v1154_v62  ;;  %v596_v18 = vperm.slane %v595_v28, 0  ;;  %v579_v37 = vsel %vm571_vm1, %v1109_v20, 0.0  ;;  %vm573_vm10 = vcmp.eq.s32.totalorder %v565_v29, 1 }
  0x4d   : > { %v584_v35 = vadd.f32 %v583_v32, %v577_v27  ;;  %v580_v30 = vsel %vm572_vm9, %v1116_v25, 0.0  ;;  %vm535_vm11 = vcmp.eq.s32.totalorder %v941_v17, %v1055_v1  ;;  %v581_v39 = vsel %vm573_vm10, %v1121_v26, 0.0 }
  0x4e   : > { %v448_v5 = vadd.f32 %v447_v24, %v1217_v4  ;;  %vm597_vm12 = vcmp.eq.s32.totalorder %v596_v18, 1 }
  0x4f   : > { %v585_v36 = vadd.f32 %v584_v35, %v578_v33  ;;  %vm598_vm13 = vmand %vm535_vm11, %vm597_vm12 }
  0x50   : > { %v452_v62 = vsel %vm1212_vm7, %v448_v5, %v1083_v9 }
  0x51   : > { %453 = vst [vmem:[#allocation2] sm:$0xff] %v452_v62  ;;  %v586_v4 = vadd.f32 %v585_v36, %v579_v37 }
  0x53   : > { %v587_v31 = vadd.f32 %v586_v4, %v580_v30 }
  0x55   : > { %v588_v38 = vadd.f32 %v587_v31, %v581_v39 }
  0x56   : > { %605 = sbr.rel (%p902_p6) target bundleno = 151 (0x97), region = 44 }
  0x57   : > { %v599_v41 = vsel %vm598_vm13, %v588_v38, 0.0 }
  0x58   : > { %v1288_v0 = vadd.f32 %v599_v41, %v594_v40 }
  0x5a   : > { %601 = vst [vmem:[#allocation4] sm:$0xff] %v1288_v0 }
  0x5b   : > { %v614_v9 = vrot.slane %v1076_v6, 2  ;;  %v615_v42 = vrot.slane %v1081_v7, 1  ;;  %vm616_vm7 = vcmask 1041409   ;;  %vm618_vm14 = vcmask 1042434   ;;  %v673_v46 = vld [vmem:[%s1366_s3] sm:$0xff] }
  0x5c   : > { %v620_v43 = vrot.slane %v1096_v14, 7  ;;  %vm621_vm15 = vcmask 1043459   ;;  %v623_v44 = vrot.slane %v1104_v19, 6  ;;  %vm624_vm0 = vcmask 1044484   ;;  %v682_v17 = vld [vmem:[%s1365_s2 + $0x8] sm:$0x1] }
  0x5d   : > { %v617_v48 = vsel %vm616_vm7, %v615_v42, %v614_v9  ;;  %v626_v49 = vrot.slane %v1109_v20, 5  ;;  %vm627_vm2 = vcmask 1045509   ;;  %v629_v51 = vrot.slane %v1116_v25, 4 }
  0x5e   : > { %v619_v50 = vsel %vm618_vm14, %v1088_v10, %v617_v48  ;;  %vm630_vm3 = vcmask 1046534   ;;  %v632_v53 = vrot.slane %v1121_v26, 3  ;;  %v674_v34 = vrot.slane %v673_v46, 4 }
  0x5f   : > { %v622_v52 = vsel %vm621_vm15, %v620_v43, %v619_v50  ;;  %vm633_vm4 = vcmask 1047559   ;;  %v698_v13 = vrot.slane %v1081_v7, 7  ;;  %v700_v23 = vrot.slane %v1088_v10, 6  ;;  %v681_v7 = vld [vmem:[%s1365_s2] sm:$0xff] }
  0x60   : > { %v625_v54 = vsel %vm624_vm0, %v623_v44, %v622_v52  ;;  %v675_v57 = vadd.f32 %v674_v34, %v673_v46  ;;  %vm688_vm6 = vcmask 1040384   ;;  %v702_v35 = vrot.slane %v1096_v14, 5 }
  0x61   : > { %v628_v56 = vsel %vm627_vm2, %v626_v49, %v625_v54  ;;  %v699_v28 = vsel %vm616_vm7, %v698_v13, %v1076_v6  ;;  %v704_v4 = vrot.slane %v1104_v19, 4  ;;  %v706_v9 = vrot.slane %v1109_v20, 3 }
  0x62   : > { %v631_v58 = vsel %vm630_vm3, %v629_v51, %v628_v56  ;;  %v676_v60 = vrot.slane %v675_v57, 2  ;;  %v701_v10 = vsel %vm618_vm14, %v700_v23, %v699_v28  ;;  %v708_v46 = vrot.slane %v1116_v25, 2 }
  0x63   : > { %v634_v59 = vsel %vm633_vm4, %v632_v53, %v631_v58  ;;  %v703_v14 = vsel %vm621_vm15, %v702_v35, %v701_v10  ;;  %v720_v19 = vrot.slane %v1288_v0, 4  ;;  %v710_v52 = vrot.slane %v1121_v26, 1 }
  0x64   : > { %v636_v61 = vadd.f32 %v634_v59, %v452_v62  ;;  %v655_v63 = vadd.f32 %v634_v59, %v1238_v47  ;;  %v677_v2 = vadd.f32 %v676_v60, %v675_v57  ;;  %v683_v47 = vadd.s32 8, %v1055_v1 }
  0x65   : > { %v705_v42 = vsel %vm624_vm0, %v704_v4, %v703_v14  ;;  %v721_v54 = vadd.f32 %v720_v19, %v1288_v0  ;;  %vm728_vm7 = vcmask 1041408  }
  0x66   : > { %v637_v3 = vrot.slane %v636_v61, 4  ;;  %v656_v8 = vrot.slane %v655_v63, 4  ;;  %v678_v55 = vrot.slane %v677_v2, 1  ;;  %v707_v50 = vsel %vm627_vm2, %v706_v9, %v705_v42 }
  0x67   : > { %v709_v34 = vsel %vm630_vm3, %v708_v46, %v707_v50 }
  0x68   : > { %v638_v11 = vmax.f32 %v636_v61, %v637_v3  ;;  %v657_v12 = vmax.f32 %v655_v63, %v656_v8  ;;  %v679_v15 = vadd.f32 %v678_v55, %v677_v2  ;;  %v711_v60 = vsel %vm633_vm4, %v710_v52, %v709_v34 }
  0x6a   : > { %v639_v16 = vrot.slane %v638_v11, 2  ;;  %v658_v21 = vrot.slane %v657_v12, 2  ;;  %vm907_vm5 = vcmp.lt.s32.totalorder %v679_v15, 0  ;;  %v908_v22 = vceil.f32 %v679_v15 }
  0x6b   : > { %v909_v45 = vfloor.f32 %v679_v15 }
  0x6c   : > { %v640_v24 = vmax.f32 %v638_v11, %v639_v16  ;;  %v659_v27 = vmax.f32 %v657_v12, %v658_v21 }
  0x6d   : > { %v910_v29 = vsel %vm907_vm5, %v908_v22, %v909_v45 }
  0x6e   : > { %v641_v32 = vrot.slane %v640_v24, 1  ;;  %v660_v5 = vrot.slane %v659_v27, 1  ;;  %v911_v33 = vcvt.f32.s32 %v910_v29 }
  0x70   : > { %v1324_v18 = vmax.f32 %v640_v24, %v641_v32  ;;  %v1326_v6 = vmax.f32 %v659_v27, %v660_v5  ;;  %vm684_vm8 = vcmp.eq.s32.totalorder %v1055_v1, %v911_v33  ;;  %vm685_vm1 = vcmp.eq.s32.totalorder %v683_v47, %v911_v33 }
  0x71   : > { %v686_v62 = vsel %vm684_vm8, %v681_v7, 0  ;;  %v687_v37 = vsel %vm685_vm1, %v682_v17, 0 }
  0x72   : > { %v643_v36 = vsub.f32 %v636_v61, %v1324_v18  ;;  %vm662_vm9 = vcmp.ge.f32.partialorder %v655_v63, %v1326_v6  ;;  %v689_v30 = vsel %vm688_vm6, %v687_v37, 0  ;;  %v722_v63 = vrot.slane %v721_v54, 2 }
  0x73   : > { %v690_v39 = vadd.s32 %v689_v30, %v686_v62  ;;  %v663_v31 = vsel %vm662_vm9, %v1055_v1, 8 }
  0x74   : > { %v644_v38 = vmul.f32 1.442695, %v643_v36  ;;  %v664_v40 = vrot.slane %v663_v31, 4  ;;  %v723_v8 = vadd.f32 %v722_v63, %v721_v54 }
  0x75   : > { %v691_v41 = vrot.slane %v690_v39, 4 }
  0x76   : > { %964 = vpow2.f32 %v644_v38  ;;  %vm665_vm10 = vcmp.lt.s32.totalorder %v663_v31, %v664_v40  ;;  %v724_v15 = vrot.slane %v723_v8, 1 }
  0x77   : > { %v692_v43 = vadd.s32 %v691_v41, %v690_v39  ;;  %v666_v44 = vsel %vm665_vm10, %v663_v31, %v664_v40 }
  0x78   : > { %v667_v48 = vrot.slane %v666_v44, 2  ;;  %v725_v22 = vadd.f32 %v724_v15, %v723_v8 }
  0x79   : > { %v693_v49 = vrot.slane %v692_v43, 2 }
  0x7a   : > { %vm668_vm11 = vcmp.lt.s32.totalorder %v666_v44, %v667_v48 }
  0x7b   : > { %v694_v51 = vadd.s32 %v693_v49, %v692_v43  ;;  %v669_v53 = vsel %vm668_vm11, %v666_v44, %v667_v48 }
  0x7c   : > { %v965_v20 = vpop.eup %964  ;;  %v670_v56 = vrot.slane %v669_v53, 1 }
  0x7d   : > { %v646_v57 = vrot.slane %v965_v20, 4  ;;  %v695_v58 = vrot.slane %v694_v51, 1 }
  0x7e   : > { %vm671_vm12 = vcmp.lt.s32.totalorder %v669_v53, %v670_v56 }
  0x7f   : > { %v647_v25 = vadd.f32 %v965_v20, %v646_v57  ;;  %v696_v59 = vadd.s32 %v695_v58, %v694_v51  ;;  %v672_v61 = vsel %vm671_vm12, %v669_v53, %v670_v56 }
  0x80   : > { %731 = vst [vmem:[%s1369_s6] sm:$0x1] %v672_v61 }
  0x81   : > { %v648_v26 = vrot.slane %v647_v25, 2  ;;  %vm697_vm13 = vcmp.eq.s32.totalorder %v1055_v1, %v696_v59 }
  0x82   : > { %v713_v2 = vsel %vm697_vm13, %v711_v60, 0.0 }
  0x83   : > { %v649_v3 = vadd.f32 %v648_v26, %v647_v25  ;;  %v714_v0 = vrot.slane %v713_v2, 4 }
  0x85   : > { %v650_v55 = vrot.slane %v649_v3, 1  ;;  %v715_v11 = vadd.f32 %v714_v0, %v713_v2 }
  0x87   : > { %v651_v12 = vadd.f32 %v650_v55, %v649_v3  ;;  %v716_v13 = vrot.slane %v715_v11, 2 }
  0x89   : > { %966 = vlog2.f32 %v651_v12  ;;  %v717_v16 = vadd.f32 %v716_v13, %v715_v11 }
  0x8b   : > { %v718_v21 = vrot.slane %v717_v16, 1 }
  0x8d   : > { %v719_v45 = vadd.f32 %v718_v21, %v717_v16 }
  0x8f   : > { %v967_v23 = vpop.eup %966  ;;  %v726_v27 = vadd.f32 %v725_v22, %v719_v45 }
  0x90   : > { %v653_v24 = vmul.f32 0.6931472, %v967_v23 }
  0x92   : > { %v654_v47 = vadd.f32 %v653_v24, %v1324_v18 }
  0x94   : > { %v727_v1 = vsel %vm688_vm6, %v654_v47, %v726_v27 }
  0x95   : > { %v729_v28 = vsel %vm728_vm7, %v727_v1, %v1326_v6 }
  0x96   : > { %730 = vst [vmem:[%s1367_s4] sm:$0x7] %v729_v28 }
  0x97 PF: > { %s17_s23 = sadd.s32 1, %s990_s23   ;;  %s1380_s21 = smov %s986_s22 }
  0x98   : > { %p14_p7 = scmp.ge.s32.totalorder %s17_s23, 10   ;;  %s1381_s22 = smov %s1383_s24 }
  0x9a   :  { %16 = sbr.rel (!%p14_p7) target bundleno = 2 (0x2), region = 107 }

</bundles_post_ra>
